<compile_context>
chip_gen: v7x
topology: tpu7x:2x2x1
jax: 0.10.0
libtpu: 0.0.40
codegen_flags: <defaults>
</compile_context>

<pallas_src>
import numpy as np
import jax
import jax.numpy as jnp
from jax.experimental import pallas as pl
from jax.experimental.pallas import tpu as pltpu


# --------------------------------------------------------------------------- #
# Kernel
# --------------------------------------------------------------------------- #
def _make_kernel(num_hidden_layers, max_action, unbounded, compute_dtype):
    """Fused MLP + mu-head kernel for a fixed (static) config.

    Ref order:
      s_ref [tb, Sp]
      per linear layer l: w_l [in_l, H], b_l [1, H]
      mu_w [H, Ap], mu_b [1, Ap]
      mu_out [tb, Ap]
    """
    n_lin = num_hidden_layers + 1

    def kernel(*refs):
        s_ref = refs[0]
        layer_refs = refs[1:1 + 2 * n_lin]
        mu_w_ref = refs[1 + 2 * n_lin]
        mu_b_ref = refs[2 + 2 * n_lin]
        mu_out_ref = refs[3 + 2 * n_lin]

        h = s_ref[...]                                        # [tb, Sp] (compute_dtype)
        for l in range(n_lin):                                # static unrolled loop
            w = layer_refs[2 * l][...]                        # [in_l, H]
            b = layer_refs[2 * l + 1][...]                    # [1, H]  (f32)
            z = jnp.dot(h, w, preferred_element_type=jnp.float32) + b
            z = jnp.maximum(z, 0.0)                           # ReLU on VPU, f32
            h = z.astype(compute_dtype)

        mu = (jnp.dot(h, mu_w_ref[...], preferred_element_type=jnp.float32)
              + mu_b_ref[...])                                # [tb, Ap], f32
        if not unbounded:
            mu = max_action * jnp.tanh(mu)                    # tanh on EUP
        mu_out_ref[...] = mu.astype(mu_out_ref.dtype)         # lane-dense (tb, 128) store

    return kernel


# --------------------------------------------------------------------------- #
# Wrapper
# --------------------------------------------------------------------------- #
def _choose_tb(B):
    """Batch tile: multiple of 8, <=128, and >=2 grid steps once B>=16 (v7x megacore)."""
    Bp = ((B + 7) // 8) * 8
    if Bp < 16:
        return 8
    for cand in (128, 64, 32, 16, 8):
        if Bp >= 2 * cand:
            return cand
    return 8


def _const_spec(shape, single_buffer):
    """Full array in VMEM, same block at every grid step (weights/biases)."""
    nd = len(shape)
    idx = lambda *_: (0,) * nd
    if single_buffer:
        return pl.BlockSpec(shape, idx, pipeline_mode=pl.Buffered(1))
    return pl.BlockSpec(shape, idx)


def _pad_axis(x, axis, new_size):
    pad = [(0, 0)] * x.ndim
    pad[axis] = (0, new_size - x.shape[axis])
    return jnp.pad(x, pad) if new_size != x.shape[axis] else x


def actor_prob_forward(s, params, *, max_action, unbounded=False,
                       compute_dtype=jnp.float32):
    """s: [B, *state_shape] -> ((mu [B, A], sigma [B, A]), None)."""
    s2 = jnp.reshape(s, (s.shape[0], -1)).astype(jnp.float32)
    B, S = s2.shape
    A = params["action_dim"]
    nh = params["layer_num"]

    # ---- lane-dense padding of S (first-layer K) and A (mu head N) ----
    Sp = max(128, ((S + 127) // 128) * 128)
    Ap = max(128, ((A + 127) // 128) * 128)
    s2 = _pad_axis(s2, 1, Sp)
    w0 = _pad_axis(params["w0"], 0, Sp)                       # zero rows -> no effect
    mu_w = _pad_axis(params["mu_w"], 1, Ap)                   # zero cols -> sliced off
    mu_b = _pad_axis(params["mu_b"], 1, Ap)

    # ---- batch tiling (pad B to a multiple of tb) ----
    tb = _choose_tb(B)
    Bp = ((B + tb - 1) // tb) * tb
    s2 = _pad_axis(s2, 0, Bp)
    grid = (Bp // tb,)

    cd = compute_dtype
    inputs = [s2.astype(cd), w0.astype(cd), params["b0"].astype(jnp.float32)]
    for l in range(nh):
        inputs += [params["w"][l].astype(cd),
                   params["b"][l].astype(jnp.float32)]
    inputs += [mu_w.astype(cd), mu_b.astype(jnp.float32)]

    # ---- VMEM budget from the tile math (v5e default scoped VMEM is 16 MiB) ----
    itemsize = np.dtype(cd).itemsize
    weight_bytes = sum(int(np.prod(x.shape)) * x.dtype.itemsize for x in inputs[1:])
    vmem_limit = (2 * tb * Sp * itemsize        # double-buffered input tile
                  + 2 * tb * Ap * 4             # double-buffered output tile
                  + 2 * weight_bytes            # margin even if single-buffered
                  + 4 * tb * max(Sp, Ap) * 4)   # activation headroom
    vmem_limit = int(1.5 * vmem_limit) + (8 << 20)
    vmem_limit = max(min(vmem_limit, 64 << 20), 16 << 20)     # <= v7x physical VMEM

    kernel = _make_kernel(nh, max_action, unbounded, cd)

    def _call(single_buffer_weights):
        in_specs = [pl.BlockSpec((tb, Sp), lambda i: (i, 0))]
        in_specs += [_const_spec(x.shape, single_buffer_weights)
                     for x in inputs[1:]]
        return pl.pallas_call(
            kernel,
            out_shape=jax.ShapeDtypeStruct((Bp, Ap), jnp.float32),
            grid=grid,
            in_specs=in_specs,
            out_specs=pl.BlockSpec((tb, Ap), lambda i: (i, 0)),
            compiler_params=pltpu.CompilerParams(
                dimension_semantics=("parallel",),
                vmem_limit_bytes=vmem_limit),
        )(*inputs)

    try:
        mu_pad = _call(True)
    except Exception:                                         # pragma: no cover
        mu_pad = _call(False)                                 # double-buffered fallback

    mu = mu_pad[:B, :A]
    # sigma is data-independent: exp once on [1, A], broadcast with XLA (not the kernel).
    sigma = jnp.broadcast_to(jnp.exp(params["sigma_log"]), (B, A))
    return (mu, sigma), None


# --------------------------------------------------------------------------- #
# Params init (PyTorch-style Linear init; weights stored pre-transposed [in, out])
# --------------------------------------------------------------------------- #
def init_params(key, layer_num, state_dim, action_dim, hidden):
    def linear(k, fan_in, fan_out):
        bound = 1.0 / np.sqrt(fan_in)
        k1, k2 = jax.random.split(k)
        w = jax.random.uniform(k1, (fan_out, fan_in), jnp.float32, -bound, bound)
        b = jax.random.uniform(k2, (fan_out,), jnp.float32, -bound, bound)
        return w.T, b[None, :]                                # [in, out], [1, out]

    params = {"layer_num": layer_num, "hidden": hidden, "action_dim": action_dim,
              "w": [], "b": []}
    key, k0 = jax.random.split(key)
    params["w0"], params["b0"] = linear(k0, state_dim, hidden)
    for _ in range(layer_num):
        key, kl = jax.random.split(key)
        w, b = linear(kl, hidden, hidden)
        params["w"].append(w)
        params["b"].append(b)
    key, km, ks = jax.random.split(key, 3)
    params["mu_w"], params["mu_b"] = linear(km, hidden, action_dim)
    # nn.Parameter(torch.zeros(A, 1)) in the module; non-trivial values so the
    # exp/broadcast path is exercised numerically.
    params["sigma_log"] = 0.1 * jax.random.normal(ks, (1, action_dim), jnp.float32)
    return params


# --------------------------------------------------------------------------- #
# Pure-JAX reference of the PyTorch forward
# --------------------------------------------------------------------------- #
def ref_forward(s, params, *, max_action, unbounded=False):
    s2 = jnp.reshape(s, (s.shape[0], -1)).astype(jnp.float32)
    h = jnp.maximum(s2 @ params["w0"] + params["b0"], 0.0)
    for l in range(params["layer_num"]):
        h = jnp.maximum(h @ params["w"][l] + params["b"][l], 0.0)
    mu = h @ params["mu_w"] + params["mu_b"]
    if not unbounded:
        mu = max_action * jnp.tanh(mu)
    sigma = jnp.exp(jnp.broadcast_to(params["sigma_log"], mu.shape))
    return mu, sigma


if __name__ == "__main__":
    # Small shapes consistent with the module: hidden_layer_size=128 (default),
    # s is [B, prod(state_shape)], action_shape -> A.
    state_dim = 16
    action_dim = 4
    hidden = 128
    layer_num = 1
    max_action = 2.0
    unbounded = False

    key = jax.random.PRNGKey(0)
    kp, ks1, ks2 = jax.random.split(key, 3)
    params = init_params(kp, layer_num, state_dim, action_dim, hidden)

    # --- test 1: tiny batch (B=2), f32 compute, tight tolerance ---
    s_small = jax.random.normal(ks1, (2, state_dim), jnp.float32)
    (mu, sigma), state = actor_prob_forward(
        s_small, params, max_action=max_action, unbounded=unbounded,
        compute_dtype=jnp.float32)
    mu, sigma = jax.block_until_ready(mu), jax.block_until_ready(sigma)
    mu_ref, sigma_ref = ref_forward(s_small, params,
                                    max_action=max_action, unbounded=unbounded)
    assert mu.shape == (2, action_dim) and sigma.shape == (2, action_dim)
    assert state is None
    np.testing.assert_allclose(np.asarray(mu), np.asarray(mu_ref),
                               rtol=1e-5, atol=1e-5)
    np.testing.assert_allclose(np.asarray(sigma), np.asarray(sigma_ref),
                               rtol=1e-5, atol=1e-5)

    # --- test 2: non-multiple batch (B=20 -> padded, multi-step parallel grid) ---
    s_big = jax.random.normal(ks2, (20, state_dim), jnp.float32)
    (mu2, sigma2), _ = actor_prob_forward(
        s_big, params, max_action=max_action, unbounded=unbounded,
        compute_dtype=jnp.float32)
    mu2, sigma2 = jax.block_until_ready(mu2), jax.block_until_ready(sigma2)
    mu2_ref, sigma2_ref = ref_forward(s_big, params,
                                      max_action=max_action, unbounded=unbounded)
    np.testing.assert_allclose(np.asarray(mu2), np.asarray(mu2_ref),
                               rtol=1e-5, atol=1e-5)
    np.testing.assert_allclose(np.asarray(sigma2), np.asarray(sigma2_ref),
                               rtol=1e-5, atol=1e-5)

    # --- test 3: bf16 compute path (v6e/v7x MXU-native), loose tolerance ---
    (mu3, sigma3), _ = actor_prob_forward(
        s_small, params, max_action=max_action, unbounded=unbounded,
        compute_dtype=jnp.bfloat16)
    mu3, sigma3 = jax.block_until_ready(mu3), jax.block_until_ready(sigma3)
    np.testing.assert_allclose(np.asarray(mu3), np.asarray(mu_ref),
                               rtol=6e-2, atol=6e-2)
    np.testing.assert_allclose(np.asarray(sigma3), np.asarray(sigma_ref),
                               rtol=1e-5, atol=1e-5)

    print("KERNEL_OK")
</pallas_src>

<mosaic_0001>
module attributes {stable_mosaic.version = 11 : i64} {
  func.func @kernel(%arg0: i32, %arg1: memref<8x128xf32, #tpu.memory_space<vmem>>, %arg2: memref<128x128xf32, #tpu.memory_space<vmem>>, %arg3: memref<1x128xf32, #tpu.memory_space<vmem>>, %arg4: memref<128x128xf32, #tpu.memory_space<vmem>>, %arg5: memref<1x128xf32, #tpu.memory_space<vmem>>, %arg6: memref<128x128xf32, #tpu.memory_space<vmem>>, %arg7: memref<1x128xf32, #tpu.memory_space<vmem>>, %arg8: memref<8x128xf32, #tpu.memory_space<vmem>>) attributes {dimension_semantics = [#tpu.dimension_semantics<parallel>], iteration_bounds = array<i64: 1>, scalar_prefetch = 0 : i64, scratch_operands = 0 : i64, tpu.core_type = #tpu.core_type<tc>, window_params = [{transform_indices = @transform_0, window_bounds = array<i64: 8, 128>}, {pipeline_mode = #tpu.pipeline_mode<synchronous>, transform_indices = @transform_1, window_bounds = array<i64: 128, 128>}, {pipeline_mode = #tpu.pipeline_mode<synchronous>, transform_indices = @transform_2, window_bounds = array<i64: 1, 128>}, {pipeline_mode = #tpu.pipeline_mode<synchronous>, transform_indices = @transform_3, window_bounds = array<i64: 128, 128>}, {pipeline_mode = #tpu.pipeline_mode<synchronous>, transform_indices = @transform_4, window_bounds = array<i64: 1, 128>}, {pipeline_mode = #tpu.pipeline_mode<synchronous>, transform_indices = @transform_5, window_bounds = array<i64: 128, 128>}, {pipeline_mode = #tpu.pipeline_mode<synchronous>, transform_indices = @transform_6, window_bounds = array<i64: 1, 128>}, {transform_indices = @transform_7, window_bounds = array<i64: 8, 128>}]} {
    %c0 = arith.constant 0 : index
    %c0_0 = arith.constant 0 : index
    %0 = vector.load %arg1[%c0, %c0_0] : memref<8x128xf32, #tpu.memory_space<vmem>>, vector<8x128xf32>
    %c0_1 = arith.constant 0 : index
    %c0_2 = arith.constant 0 : index
    %1 = vector.load %arg2[%c0_1, %c0_2] : memref<128x128xf32, #tpu.memory_space<vmem>>, vector<128x128xf32>
    %c0_3 = arith.constant 0 : index
    %c0_4 = arith.constant 0 : index
    %2 = vector.load %arg3[%c0_3, %c0_4] : memref<1x128xf32, #tpu.memory_space<vmem>>, vector<1x128xf32>
    %cst = arith.constant dense<0.000000e+00> : vector<8x128xf32>
    %3 = tpu.matmul %0, %1, %cst {dimension_numbers = #tpu.dot_dimension_numbers<[1], [0], [0], [1], [0, 0, 1, 1], [], []>} : vector<8x128xf32>, vector<128x128xf32>, vector<8x128xf32> -> vector<8x128xf32>
    %4 = vector.broadcast %2 : vector<1x128xf32> to vector<8x128xf32>
    %5 = arith.addf %3, %4 : vector<8x128xf32>
    %cst_5 = arith.constant 0.000000e+00 : f32
    %6 = vector.broadcast %cst_5 : f32 to vector<8x128xf32>
    %7 = arith.maximumf %5, %6 : vector<8x128xf32>
    %c0_6 = arith.constant 0 : index
    %c0_7 = arith.constant 0 : index
    %8 = vector.load %arg4[%c0_6, %c0_7] : memref<128x128xf32, #tpu.memory_space<vmem>>, vector<128x128xf32>
    %c0_8 = arith.constant 0 : index
    %c0_9 = arith.constant 0 : index
    %9 = vector.load %arg5[%c0_8, %c0_9] : memref<1x128xf32, #tpu.memory_space<vmem>>, vector<1x128xf32>
    %cst_10 = arith.constant dense<0.000000e+00> : vector<8x128xf32>
    %10 = tpu.matmul %7, %8, %cst_10 {dimension_numbers = #tpu.dot_dimension_numbers<[1], [0], [0], [1], [0, 0, 1, 1], [], []>} : vector<8x128xf32>, vector<128x128xf32>, vector<8x128xf32> -> vector<8x128xf32>
    %11 = vector.broadcast %9 : vector<1x128xf32> to vector<8x128xf32>
    %12 = arith.addf %10, %11 : vector<8x128xf32>
    %cst_11 = arith.constant 0.000000e+00 : f32
    %13 = vector.broadcast %cst_11 : f32 to vector<8x128xf32>
    %14 = arith.maximumf %12, %13 : vector<8x128xf32>
    %c0_12 = arith.constant 0 : index
    %c0_13 = arith.constant 0 : index
    %15 = vector.load %arg6[%c0_12, %c0_13] : memref<128x128xf32, #tpu.memory_space<vmem>>, vector<128x128xf32>
    %cst_14 = arith.constant dense<0.000000e+00> : vector<8x128xf32>
    %16 = tpu.matmul %14, %15, %cst_14 {dimension_numbers = #tpu.dot_dimension_numbers<[1], [0], [0], [1], [0, 0, 1, 1], [], []>} : vector<8x128xf32>, vector<128x128xf32>, vector<8x128xf32> -> vector<8x128xf32>
    %c0_15 = arith.constant 0 : index
    %c0_16 = arith.constant 0 : index
    %17 = vector.load %arg7[%c0_15, %c0_16] : memref<1x128xf32, #tpu.memory_space<vmem>>, vector<1x128xf32>
    %18 = vector.broadcast %17 : vector<1x128xf32> to vector<8x128xf32>
    %19 = arith.addf %16, %18 : vector<8x128xf32>
    %20 = math.tanh %19 : vector<8x128xf32>
    %cst_17 = arith.constant 2.000000e+00 : f32
    %21 = vector.broadcast %cst_17 : f32 to vector<8x128xf32>
    %22 = arith.mulf %21, %20 : vector<8x128xf32>
    %c0_18 = arith.constant 0 : index
    %c0_19 = arith.constant 0 : index
    %23 = vector.load %arg8[%c0_18, %c0_19] : memref<8x128xf32, #tpu.memory_space<vmem>>, vector<8x128xf32>
    tpu.vector_store %arg8[%c0_18, %c0_19], %22 {strides = array<i32>} : memref<8x128xf32, #tpu.memory_space<vmem>>, vector<8x128xf32>,
    return
  }
  func.func @transform_0(%arg0: i32) -> (i32, i32) {
    %c0_i32 = arith.constant 0 : i32
    %c0_i32_0 = arith.constant 0 : i32
    return %arg0, %c0_i32 : i32, i32
  }
  func.func @transform_1(%arg0: i32) -> (i32, i32) {
    %c0_i32 = arith.constant 0 : i32
    %c0_i32_0 = arith.constant 0 : i32
    %c0_i32_1 = arith.constant 0 : i32
    return %c0_i32, %c0_i32_0 : i32, i32
  }
  func.func @transform_2(%arg0: i32) -> (i32, i32) {
    %c0_i32 = arith.constant 0 : i32
    %c0_i32_0 = arith.constant 0 : i32
    %c0_i32_1 = arith.constant 0 : i32
    return %c0_i32, %c0_i32_0 : i32, i32
  }
  func.func @transform_3(%arg0: i32) -> (i32, i32) {
    %c0_i32 = arith.constant 0 : i32
    %c0_i32_0 = arith.constant 0 : i32
    %c0_i32_1 = arith.constant 0 : i32
    return %c0_i32, %c0_i32_0 : i32, i32
  }
  func.func @transform_4(%arg0: i32) -> (i32, i32) {
    %c0_i32 = arith.constant 0 : i32
    %c0_i32_0 = arith.constant 0 : i32
    %c0_i32_1 = arith.constant 0 : i32
    return %c0_i32, %c0_i32_0 : i32, i32
  }
  func.func @transform_5(%arg0: i32) -> (i32, i32) {
    %c0_i32 = arith.constant 0 : i32
    %c0_i32_0 = arith.constant 0 : i32
    %c0_i32_1 = arith.constant 0 : i32
    return %c0_i32, %c0_i32_0 : i32, i32
  }
  func.func @transform_6(%arg0: i32) -> (i32, i32) {
    %c0_i32 = arith.constant 0 : i32
    %c0_i32_0 = arith.constant 0 : i32
    %c0_i32_1 = arith.constant 0 : i32
    return %c0_i32, %c0_i32_0 : i32, i32
  }
  func.func @transform_7(%arg0: i32) -> (i32, i32) {
    %c0_i32 = arith.constant 0 : i32
    %c0_i32_0 = arith.constant 0 : i32
    return %arg0, %c0_i32 : i32, i32
  }
}

module attributes {stable_mosaic.version = 11 : i64} {
  func.func @kernel(%arg0: i32, %arg1: memref<8x128xf32, #tpu.memory_space<vmem>>, %arg2: memref<128x128xf32, #tpu.memory_space<vmem>>, %arg3: memref<1x128xf32, #tpu.memory_space<vmem>>, %arg4: memref<128x128xf32, #tpu.memory_space<vmem>>, %arg5: memref<1x128xf32, #tpu.memory_space<vmem>>, %arg6: memref<128x128xf32, #tpu.memory_space<vmem>>, %arg7: memref<1x128xf32, #tpu.memory_space<vmem>>, %arg8: memref<8x128xf32, #tpu.memory_space<vmem>>) attributes {dimension_semantics = [#tpu.dimension_semantics<parallel>], iteration_bounds = array<i64: 1>, scalar_prefetch = 0 : i64, scratch_operands = 0 : i64, tpu.core_type = #tpu.core_type<tc>, window_params = [{transform_indices = @transform_0, window_bounds = array<i64: 8, 128>}, {pipeline_mode = #tpu.pipeline_mode<synchronous>, transform_indices = @transform_1, window_bounds = array<i64: 128, 128>}, {pipeline_mode = #tpu.pipeline_mode<synchronous>, transform_indices = @transform_2, window_bounds = array<i64: 1, 128>}, {pipeline_mode = #tpu.pipeline_mode<synchronous>, transform_indices = @transform_3, window_bounds = array<i64: 128, 128>}, {pipeline_mode = #tpu.pipeline_mode<synchronous>, transform_indices = @transform_4, window_bounds = array<i64: 1, 128>}, {pipeline_mode = #tpu.pipeline_mode<synchronous>, transform_indices = @transform_5, window_bounds = array<i64: 128, 128>}, {pipeline_mode = #tpu.pipeline_mode<synchronous>, transform_indices = @transform_6, window_bounds = array<i64: 1, 128>}, {transform_indices = @transform_7, window_bounds = array<i64: 8, 128>}]} {
    %c0 = arith.constant 0 : index
    %c0_0 = arith.constant 0 : index
    %0 = vector.load %arg1[%c0, %c0_0] : memref<8x128xf32, #tpu.memory_space<vmem>>, vector<8x128xf32>
    %c0_1 = arith.constant 0 : index
    %c0_2 = arith.constant 0 : index
    %1 = vector.load %arg2[%c0_1, %c0_2] : memref<128x128xf32, #tpu.memory_space<vmem>>, vector<128x128xf32>
    %c0_3 = arith.constant 0 : index
    %c0_4 = arith.constant 0 : index
    %2 = vector.load %arg3[%c0_3, %c0_4] : memref<1x128xf32, #tpu.memory_space<vmem>>, vector<1x128xf32>
    %cst = arith.constant dense<0.000000e+00> : vector<8x128xf32>
    %3 = tpu.matmul %0, %1, %cst {dimension_numbers = #tpu.dot_dimension_numbers<[1], [0], [0], [1], [0, 0, 1, 1], [], []>} : vector<8x128xf32>, vector<128x128xf32>, vector<8x128xf32> -> vector<8x128xf32>
    %4 = vector.broadcast %2 : vector<1x128xf32> to vector<8x128xf32>
    %5 = arith.addf %3, %4 : vector<8x128xf32>
    %cst_5 = arith.constant 0.000000e+00 : f32
    %6 = vector.broadcast %cst_5 : f32 to vector<8x128xf32>
    %7 = arith.maximumf %5, %6 : vector<8x128xf32>
    %c0_6 = arith.constant 0 : index
    %c0_7 = arith.constant 0 : index
    %8 = vector.load %arg4[%c0_6, %c0_7] : memref<128x128xf32, #tpu.memory_space<vmem>>, vector<128x128xf32>
    %c0_8 = arith.constant 0 : index
    %c0_9 = arith.constant 0 : index
    %9 = vector.load %arg5[%c0_8, %c0_9] : memref<1x128xf32, #tpu.memory_space<vmem>>, vector<1x128xf32>
    %cst_10 = arith.constant dense<0.000000e+00> : vector<8x128xf32>
    %10 = tpu.matmul %7, %8, %cst_10 {dimension_numbers = #tpu.dot_dimension_numbers<[1], [0], [0], [1], [0, 0, 1, 1], [], []>} : vector<8x128xf32>, vector<128x128xf32>, vector<8x128xf32> -> vector<8x128xf32>
    %11 = vector.broadcast %9 : vector<1x128xf32> to vector<8x128xf32>
    %12 = arith.addf %10, %11 : vector<8x128xf32>
    %cst_11 = arith.constant 0.000000e+00 : f32
    %13 = vector.broadcast %cst_11 : f32 to vector<8x128xf32>
    %14 = arith.maximumf %12, %13 : vector<8x128xf32>
    %c0_12 = arith.constant 0 : index
    %c0_13 = arith.constant 0 : index
    %15 = vector.load %arg6[%c0_12, %c0_13] : memref<128x128xf32, #tpu.memory_space<vmem>>, vector<128x128xf32>
    %cst_14 = arith.constant dense<0.000000e+00> : vector<8x128xf32>
    %16 = tpu.matmul %14, %15, %cst_14 {dimension_numbers = #tpu.dot_dimension_numbers<[1], [0], [0], [1], [0, 0, 1, 1], [], []>} : vector<8x128xf32>, vector<128x128xf32>, vector<8x128xf32> -> vector<8x128xf32>
    %c0_15 = arith.constant 0 : index
    %c0_16 = arith.constant 0 : index
    %17 = vector.load %arg7[%c0_15, %c0_16] : memref<1x128xf32, #tpu.memory_space<vmem>>, vector<1x128xf32>
    %18 = vector.broadcast %17 : vector<1x128xf32> to vector<8x128xf32>
    %19 = arith.addf %16, %18 : vector<8x128xf32>
    %20 = math.tanh %19 : vector<8x128xf32>
    %cst_17 = arith.constant 2.000000e+00 : f32
    %21 = vector.broadcast %cst_17 : f32 to vector<8x128xf32>
    %22 = arith.mulf %21, %20 : vector<8x128xf32>
    %c0_18 = arith.constant 0 : index
    %c0_19 = arith.constant 0 : index
    %23 = vector.load %arg8[%c0_18, %c0_19] : memref<8x128xf32, #tpu.memory_space<vmem>>, vector<8x128xf32>
    tpu.vector_store %arg8[%c0_18, %c0_19], %22 {strides = array<i32>} : memref<8x128xf32, #tpu.memory_space<vmem>>, vector<8x128xf32>,
    return
  }
  func.func @transform_0(%arg0: i32) -> (i32, i32) {
    %c0_i32 = arith.constant 0 : i32
    %c0_i32_0 = arith.constant 0 : i32
    return %arg0, %c0_i32 : i32, i32
  }
  func.func @transform_1(%arg0: i32) -> (i32, i32) {
    %c0_i32 = arith.constant 0 : i32
    %c0_i32_0 = arith.constant 0 : i32
    %c0_i32_1 = arith.constant 0 : i32
    return %c0_i32, %c0_i32_0 : i32, i32
  }
  func.func @transform_2(%arg0: i32) -> (i32, i32) {
    %c0_i32 = arith.constant 0 : i32
    %c0_i32_0 = arith.constant 0 : i32
    %c0_i32_1 = arith.constant 0 : i32
    return %c0_i32, %c0_i32_0 : i32, i32
  }
  func.func @transform_3(%arg0: i32) -> (i32, i32) {
    %c0_i32 = arith.constant 0 : i32
    %c0_i32_0 = arith.constant 0 : i32
    %c0_i32_1 = arith.constant 0 : i32
    return %c0_i32, %c0_i32_0 : i32, i32
  }
  func.func @transform_4(%arg0: i32) -> (i32, i32) {
    %c0_i32 = arith.constant 0 : i32
    %c0_i32_0 = arith.constant 0 : i32
    %c0_i32_1 = arith.constant 0 : i32
    return %c0_i32, %c0_i32_0 : i32, i32
  }
  func.func @transform_5(%arg0: i32) -> (i32, i32) {
    %c0_i32 = arith.constant 0 : i32
    %c0_i32_0 = arith.constant 0 : i32
    %c0_i32_1 = arith.constant 0 : i32
    return %c0_i32, %c0_i32_0 : i32, i32
  }
  func.func @transform_6(%arg0: i32) -> (i32, i32) {
    %c0_i32 = arith.constant 0 : i32
    %c0_i32_0 = arith.constant 0 : i32
    %c0_i32_1 = arith.constant 0 : i32
    return %c0_i32, %c0_i32_0 : i32, i32
  }
  func.func @transform_7(%arg0: i32) -> (i32, i32) {
    %c0_i32 = arith.constant 0 : i32
    %c0_i32_0 = arith.constant 0 : i32
    return %arg0, %c0_i32 : i32, i32
  }
}

</mosaic_0001>

<bundles_post_ra>
// kernel: tpu_custom_call.1
= control target key start
LH: loop header
LB: loop body
LE: loop exit
PB: predicated region body
PF: predicated region fallthrough
CT: control target
= control target key end

     0   :  { %12 = vsyncpa [#allocation3], 0  ;;  %s901_s0 = inlined_call_operand.hbm [shape: f32[8,128], index: 0, kind: input, shape index: {}]   ;;  %s902_s1 = inlined_call_operand.hbm [shape: f32[128,128], index: 1, kind: input, shape index: {}]   ;;  %s903_s2 = inlined_call_operand.vmem [shape: f32[1,128], index: 2, kind: input, shape index: {}]   ;;  %s904_s3 = inlined_call_operand.hbm [shape: f32[128,128], index: 3, kind: input, shape index: {}]   ;;  %s905_s4 = inlined_call_operand.vmem [shape: f32[1,128], index: 4, kind: input, shape index: {}]   ;;  %s906_s5 = inlined_call_operand.hbm [shape: f32[128,128], index: 5, kind: input, shape index: {}]   ;;  %s907_s6 = inlined_call_operand.vmem [shape: f32[1,128], index: 6, kind: input, shape index: {}]   ;;  %s908_s7 = inlined_call_operand.hbm [shape: f32[8,128], index: 7, kind: output, shape index: {}]  }
   0x1   :  { %13 = vsyncpa [#allocation6], 0 }
   0x2   :  { %14 = vsyncpa [#allocation9], 0 }
   0x3   :  { %15 = vsyncpa [#allocation4], 0  ;;  %s743_s24 = smov [#allocation5]   ;;  %s625_s28 = scalar_lea.hbm %s902_s1, 2048 }
   0x4   :  { %s31_s25 = sshll.u32 %s743_s24, 4  ;;  %p626_p0 = scmp.ne.s32.totalorder %s902_s1, %s625_s28  ;;  %s32_s25 = int_to_ptr.vmem [resolvable:$true] %s31_s25 }
   0x5   :  { %p629_p1 = scmp.lt.u32.totalorder %s625_s28, %s902_s1 }
   0x7   :  { %p631_p2 = pnand %p629_p1, %p626_p0 }
   0x9   :  { %634 = shalt.err (!%p631_p2)
}
   0xa   :  { %s635_s10 = scalar_lea.vmem %s32_s25, 2048  ;;  %p640_p4 = scmp.lt.s32.totalorder %s32_s25, %s32_s25 }
   0xb   :  { %p636_p3 = scmp.ne.s32.totalorder %s32_s25, %s635_s10  ;;  %p641_p5 = scmp.lt.s32.totalorder %s635_s10, %s635_s10 }
   0xd   :  { %p642_p6 = por %p641_p5, %p640_p4 }
   0xf   :  { %p643_p7 = pnand %p642_p6, %p636_p3 }
  0x11   :  { %646 = shalt.err (!%p643_p7)
}
  0x12   :  { %s744_s11 = smov 128   ;;  %s745_s12 = smov 8  }
  0x13   :  { %37 = dma.hbm_to_vmem [thread:$0]  %s902_s1, 2048, %s32_s25, [#allocation6], %s744_s11, %s744_s11, %s745_s12  }
  0x14   :  { %s746_s15 = smov [#allocation2]   ;;  %s747_s17 = smov [#allocation7]  }
  0x15   :  { %s22_s16 = sshll.u32 %s746_s15, 4  ;;  %s45_s18 = sshll.u32 %s747_s17, 4  ;;  %s23_s16 = int_to_ptr.vmem [resolvable:$true] %s22_s16  ;;  %s46_s18 = int_to_ptr.vmem [resolvable:$true] %s45_s18 }
  0x16   :  { %s647_s21 = scalar_lea.hbm %s901_s0, 128 }
  0x17   :  { %p648_p8 = scmp.ne.s32.totalorder %s901_s0, %s647_s21  ;;  %p651_p9 = scmp.lt.u32.totalorder %s647_s21, %s901_s0 }
  0x19   :  { %p653_p10 = pnand %p651_p9, %p648_p8 }
  0x1b   :  { %656 = shalt.err (!%p653_p10)
}
  0x1c   :  { %s657_s1 = scalar_lea.vmem %s23_s16, 128  ;;  %p662_p12 = scmp.lt.s32.totalorder %s23_s16, %s23_s16 }
  0x1d   :  { %p658_p11 = scmp.ne.s32.totalorder %s23_s16, %s657_s1  ;;  %p663_p13 = scmp.lt.s32.totalorder %s657_s1, %s657_s1 }
  0x1f   :  { %p664_p0 = por %p663_p13, %p662_p12 }
  0x21   :  { %p665_p1 = pnand %p664_p0, %p658_p11 }
  0x23   :  { %668 = shalt.err (!%p665_p1)
}
  0x24   :  { %25 = dma.hbm_to_vmem [thread:$0]  %s901_s0, 128, %s23_s16, [#allocation3]  }
  0x25   :  { %s669_s30 = scalar_lea.hbm %s904_s3, 2048 }
  0x26   :  { %p670_p2 = scmp.ne.s32.totalorder %s904_s3, %s669_s30  ;;  %p673_p3 = scmp.lt.u32.totalorder %s669_s30, %s904_s3 }
  0x28   :  { %p675_p4 = pnand %p673_p3, %p670_p2 }
  0x2a   :  { %678 = shalt.err (!%p675_p4)
}
  0x2b   :  { %s679_s14 = scalar_lea.vmem %s46_s18, 2048  ;;  %p684_p6 = scmp.lt.s32.totalorder %s46_s18, %s46_s18 }
  0x2c   :  { %p680_p5 = scmp.ne.s32.totalorder %s46_s18, %s679_s14  ;;  %p685_p7 = scmp.lt.s32.totalorder %s679_s14, %s679_s14 }
  0x2e   :  { %p686_p8 = por %p685_p7, %p684_p6 }
  0x30   :  { %p687_p9 = pnand %p686_p8, %p680_p5 }
  0x32   :  { %690 = shalt.err (!%p687_p9)
}
  0x33   :  { %51 = dma.hbm_to_vmem [thread:$0]  %s904_s3, 2048, %s46_s18, [#allocation6], %s744_s11, %s744_s11, %s745_s12  }
  0x34   :  { %s748_s16 = smov [#allocation8]   ;;  %s691_s21 = scalar_lea.hbm %s906_s5, 2048 }
  0x35   :  { %s59_s17 = sshll.u32 %s748_s16, 4  ;;  %p692_p10 = scmp.ne.s32.totalorder %s906_s5, %s691_s21  ;;  %s60_s17 = int_to_ptr.vmem [resolvable:$true] %s59_s17 }
  0x36   :  { %p695_p11 = scmp.lt.u32.totalorder %s691_s21, %s906_s5 }
  0x38   :  { %p697_p12 = pnand %p695_p11, %p692_p10 }
  0x3a   :  { %700 = shalt.err (!%p697_p12)
}
  0x3b   :  { %s701_s1 = scalar_lea.vmem %s60_s17, 2048  ;;  %p706_p0 = scmp.lt.s32.totalorder %s60_s17, %s60_s17 }
  0x3c   :  { %p702_p13 = scmp.ne.s32.totalorder %s60_s17, %s701_s1  ;;  %p707_p1 = scmp.lt.s32.totalorder %s701_s1, %s701_s1 }
  0x3e   :  { %p708_p2 = por %p707_p1, %p706_p0 }
  0x40   :  { %p709_p3 = pnand %p708_p2, %p702_p13 }
  0x42   :  { %712 = shalt.err (!%p709_p3)
}
  0x43   :  { %65 = dma.hbm_to_vmem [thread:$0]  %s906_s5, 2048, %s60_s17, [#allocation9], %s744_s11, %s744_s11, %s745_s12  }
  0x44   :  { %735 = dma.done.wait [#allocation3], 128  }
  0x45   :  { %736 = vsyncadd [#allocation3], 4294967168 }
  0x46   :  { %737 = dma.done.wait [#allocation6], 4096  }
  0x47   :  { %738 = vsyncadd [#allocation6], 4294963200 }
  0x48   :  { %739 = dma.done.wait [#allocation9], 2048  }
  0x49   :  { %740 = vsyncadd [#allocation9], 4294965248  ;;  %v749_v0 = vmov 0.0|0.0   ;;  %vm750_vm0 = vmmov 0   ;;  %v751_v1 = vmov 0.0   ;;  %v81_v2 = vld [vmem:[#allocation5] sm:$0xff] }
  0x4a   :  { %541 = vmatprep.subr.bf16.mxu0 %v749_v0  ;;  %468 = vmatprep.mubr.msk.f32.mxu0 %vm750_vm0, %v751_v1  ;;  %v82_v3 = vld [vmem:[#allocation5 + $0x8] sm:$0xff]  ;;  %v83_v4 = vld [vmem:[#allocation5 + $0x10] sm:$0xff]  ;;  %v84_v6 = vld [vmem:[#allocation5 + $0x18] sm:$0xff]  ;;  %s752_s28 = smov [#allocation10]  }
  0x4b   :  { %565 = vmatprep.subr.bf16.mxu1 %v749_v0  ;;  %503 = vmatprep.mubr.msk.f32.mxu1 %vm750_vm0, %v751_v1  ;;  %v542_v5 = vpack.c.bf16 %v82_v3, %v81_v2  ;;  %v545_v7 = vpack.c.bf16 %v84_v6, %v83_v4  ;;  %v85_v8 = vld [vmem:[#allocation5 + $0x20] sm:$0xff]  ;;  %v86_v9 = vld [vmem:[#allocation5 + $0x28] sm:$0xff]  ;;  %v177_v12 = vld [vmem:[#allocation7 + $0x10] sm:$0xff]  ;;  %s371_s29 = sshll.u32 %s752_s28, 4  ;;  %s372_s29 = int_to_ptr.vmem [resolvable:$true] %s371_s29 }
  0x4c   :  { %v175_v10 = vld [vmem:[#allocation7] sm:$0xff]  ;;  %v176_v11 = vld [vmem:[#allocation7 + $0x8] sm:$0xff]  ;;  %v178_v13 = vld [vmem:[#allocation7 + $0x18] sm:$0xff]  ;;  %v548_v14 = vpack.c.bf16 %v86_v9, %v85_v8  ;;  %p718_p5 = scmp.lt.s32.totalorder %s372_s29, %s372_s29 }
  0x4d   :  { %543 = vmatpush3.bf16.msra.mxu0 %v542_v5  ;;  %v566_v15 = vpack.c.bf16 %v176_v11, %v175_v10  ;;  %v87_v16 = vld [vmem:[#allocation5 + $0x30] sm:$0xff]  ;;  %v88_v17 = vld [vmem:[#allocation5 + $0x38] sm:$0xff]  ;;  %v569_v18 = vpack.c.bf16 %v178_v13, %v177_v12  ;;  %v179_v19 = vld [vmem:[#allocation7 + $0x20] sm:$0xff] }
  0x4e   :  { %544 = vmatprep.subr.bf16.mxu0 %v749_v0  ;;  %v180_v20 = vld [vmem:[#allocation7 + $0x28] sm:$0xff]  ;;  %v551_v21 = vpack.c.bf16 %v88_v17, %v87_v16  ;;  %v89_v22 = vld [vmem:[#allocation5 + $0x40] sm:$0xff]  ;;  %v181_v25 = vld [vmem:[#allocation7 + $0x30] sm:$0xff] }
  0x4f   :  { %567 = vmatpush3.bf16.msra.mxu1 %v566_v15  ;;  %v90_v23 = vld [vmem:[#allocation5 + $0x48] sm:$0xff]  ;;  %v572_v24 = vpack.c.bf16 %v180_v20, %v179_v19  ;;  %v182_v26 = vld [vmem:[#allocation7 + $0x38] sm:$0xff]  ;;  %v91_v28 = vld [vmem:[#allocation5 + $0x50] sm:$0xff] }
  0x50   :  { %568 = vmatprep.subr.bf16.mxu1 %v749_v0  ;;  %v554_v27 = vpack.c.bf16 %v90_v23, %v89_v22  ;;  %v92_v29 = vld [vmem:[#allocation5 + $0x58] sm:$0xff]  ;;  %v575_v30 = vpack.c.bf16 %v182_v26, %v181_v25  ;;  %v183_v31 = vld [vmem:[#allocation7 + $0x40] sm:$0xff]  ;;  %v184_v32 = vld [vmem:[#allocation7 + $0x48] sm:$0xff] }
  0x51   :  { %546 = vmatpush3.bf16.msra.mxu0 %v545_v7  ;;  %v557_v33 = vpack.c.bf16 %v92_v29, %v91_v28  ;;  %v93_v34 = vld [vmem:[#allocation5 + $0x60] sm:$0xff]  ;;  %v94_v35 = vld [vmem:[#allocation5 + $0x68] sm:$0xff]  ;;  %v578_v36 = vpack.c.bf16 %v184_v32, %v183_v31  ;;  %v185_v37 = vld [vmem:[#allocation7 + $0x50] sm:$0xff] }
  0x52   :  { %547 = vmatprep.subr.bf16.mxu0 %v749_v0  ;;  %v186_v38 = vld [vmem:[#allocation7 + $0x58] sm:$0xff]  ;;  %v560_v39 = vpack.c.bf16 %v94_v35, %v93_v34  ;;  %v95_v40 = vld [vmem:[#allocation5 + $0x70] sm:$0xff]  ;;  %v187_v43 = vld [vmem:[#allocation7 + $0x60] sm:$0xff] }
  0x53   :  { %570 = vmatpush3.bf16.msra.mxu1 %v569_v18  ;;  %v96_v41 = vld [vmem:[#allocation5 + $0x78] sm:$0xff]  ;;  %v581_v42 = vpack.c.bf16 %v186_v38, %v185_v37  ;;  %v188_v44 = vld [vmem:[#allocation7 + $0x68] sm:$0xff]  ;;  %v189_v48 = vld [vmem:[#allocation7 + $0x70] sm:$0xff] }
  0x54   :  { %571 = vmatprep.subr.bf16.mxu1 %v749_v0  ;;  %v563_v45 = vpack.c.bf16 %v96_v41, %v95_v40  ;;  %v584_v46 = vpack.c.bf16 %v188_v44, %v187_v43  ;;  %v80_v47 = vld [vmem:[#allocation2] sm:$0xff]  ;;  %v269_v51 = vld [vmem:[#allocation8] sm:$0xff]  ;;  %v270_v52 = vld [vmem:[#allocation8 + $0x8] sm:$0xff] }
  0x55   :  { %549 = vmatpush3.bf16.msra.mxu0 %v548_v14  ;;  %v190_v49 = vld [vmem:[#allocation7 + $0x78] sm:$0xff]  ;;  %v271_v53 = vld [vmem:[#allocation8 + $0x10] sm:$0xff]  ;;  %v590_v54 = vpack.c.bf16 %v270_v52, %v269_v51  ;;  %v273_v57 = vld [vmem:[#allocation8 + $0x20] sm:$0xff] }
  0x56   :  { %550 = vmatprep.subr.bf16.mxu0 %v749_v0  ;;  %v587_v50 = vpack.c.bf16 %v190_v49, %v189_v48  ;;  %v272_v55 = vld [vmem:[#allocation8 + $0x18] sm:$0xff]  ;;  %v274_v58 = vld [vmem:[#allocation8 + $0x28] sm:$0xff]  ;;  %v275_v60 = vld [vmem:[#allocation8 + $0x30] sm:$0xff] }
  0x57   :  { %573 = vmatpush3.bf16.msra.mxu1 %v572_v24  ;;  %v593_v56 = vpack.c.bf16 %v272_v55, %v271_v53  ;;  %v596_v59 = vpack.c.bf16 %v274_v58, %v273_v57  ;;  %v276_v61 = vld [vmem:[#allocation8 + $0x38] sm:$0xff]  ;;  %v277_v63 = vld [vmem:[#allocation8 + $0x40] sm:$0xff]  ;;  %v279_v3 = vld [vmem:[#allocation8 + $0x50] sm:$0xff] }
  0x58   :  { %574 = vmatprep.subr.bf16.mxu1 %v749_v0  ;;  %v599_v62 = vpack.c.bf16 %v276_v61, %v275_v60  ;;  %v280_v4 = vld [vmem:[#allocation8 + $0x58] sm:$0xff]  ;;  %v281_v6 = vld [vmem:[#allocation8 + $0x60] sm:$0xff]  ;;  %v282_v7 = vld [vmem:[#allocation8 + $0x68] sm:$0xff] }
  0x59   :  { %552 = vmatpush3.bf16.msra.mxu0 %v551_v21  ;;  %v605_v5 = vpack.c.bf16 %v280_v4, %v279_v3  ;;  %v608_v8 = vpack.c.bf16 %v282_v7, %v281_v6  ;;  %v382_v9 = vld [vmem:[%s903_s2] ss:$0 sm:$0xff]  ;;  %v283_v14 = vld [vmem:[#allocation8 + $0x70] sm:$0xff] }
  0x5a   :  { %553 = vmatprep.subr.bf16.mxu0 %v749_v0  ;;  %v284_v15 = vld [vmem:[#allocation8 + $0x78] sm:$0xff] }
  0x5b   :  { %576 = vmatpush3.bf16.msra.mxu1 %v575_v30  ;;  %v611_v16 = vpack.c.bf16 %v284_v15, %v283_v14  ;;  %v383_v17 = vld [vmem:[%s905_s4] ss:$0 sm:$0xff]  ;;  %s713_s4 = scalar_lea.vmem %s372_s29, 128 }
  0x5c   :  { %577 = vmatprep.subr.bf16.mxu1 %v749_v0  ;;  %v384_v21 = vld [vmem:[%s907_s6] ss:$0 sm:$0xff]  ;;  %p714_p4 = scmp.ne.s32.totalorder %s372_s29, %s713_s4  ;;  %p719_p6 = scmp.lt.s32.totalorder %s713_s4, %s713_s4 }
  0x5d   :  { %555 = vmatpush3.bf16.msra.mxu0 %v554_v27 }
  0x5e   :  { %556 = vmatprep.subr.bf16.mxu0 %v749_v0  ;;  %p720_p7 = por %p719_p6, %p718_p5 }
  0x5f   :  { %579 = vmatpush3.bf16.msra.mxu1 %v578_v36 }
  0x60   :  { %580 = vmatprep.subr.bf16.mxu1 %v749_v0  ;;  %p721_p8 = pnand %p720_p7, %p714_p4 }
  0x61   :  { %558 = vmatpush3.bf16.msra.mxu0 %v557_v33 }
  0x62   :  { %559 = vmatprep.subr.bf16.mxu0 %v749_v0 }
  0x63   :  { %582 = vmatpush3.bf16.msra.mxu1 %v581_v42 }
  0x64   :  { %583 = vmatprep.subr.bf16.mxu1 %v749_v0 }
  0x65   :  { %561 = vmatpush3.bf16.msra.mxu0 %v560_v39 }
  0x66   :  { %562 = vmatprep.subr.bf16.mxu0 %v749_v0 }
  0x67   :  { %585 = vmatpush3.bf16.msra.mxu1 %v584_v46 }
  0x68   :  { %586 = vmatprep.subr.bf16.mxu1 %v749_v0 }
  0x69   :  { %564 = vmatpush3.bf16.msra.mxu0 %v563_v45 }
  0x6a   :  { %589 = vmatprep.subr.bf16.mxu0 %v749_v0 }
  0x6b   :  { %588 = vmatpush3.bf16.msra.mxu1 %v587_v50 }
  0x6c   :  { %469 = vmatmul.mubr.f32.vlgmr.msra.gmra.mrb[0].mxu0 %v80_v47 }
  0x6d   :  { %538 = vmatprep.mubr.msk.f32.mxu0 %vm750_vm0, %v751_v1  ;;  %591 = vmatpush3.bf16.msra.mxu0 %v590_v54  ;;  %v278_v1 = vld [vmem:[#allocation8 + $0x48] sm:$0xff] }
  0x6e   :  { %592 = vmatprep.subr.bf16.mxu0 %v749_v0  ;;  %v602_v2 = vpack.c.bf16 %v278_v1, %v277_v63 }
  0x71   :  { %594 = vmatpush3.bf16.msra.mxu0 %v593_v56 }
  0x72   :  { %595 = vmatprep.subr.bf16.mxu0 %v749_v0 }
  0x75   :  { %597 = vmatpush3.bf16.msra.mxu0 %v596_v59 }
  0x76   :  { %598 = vmatprep.subr.bf16.mxu0 %v749_v0 }
  0x79   :  { %600 = vmatpush3.bf16.msra.mxu0 %v599_v62 }
  0x7a   :  { %601 = vmatprep.subr.bf16.mxu0 %v749_v0 }
  0x7d   :  { %603 = vmatpush3.bf16.msra.mxu0 %v602_v2 }
  0x7e   :  { %604 = vmatprep.subr.bf16.mxu0 %v749_v0 }
  0x81   :  { %606 = vmatpush3.bf16.msra.mxu0 %v605_v5 }
  0x82   :  { %607 = vmatprep.subr.bf16.mxu0 %v749_v0 }
  0x85   :  { %609 = vmatpush3.bf16.msra.mxu0 %v608_v8 }
  0x86   :  { %610 = vmatprep.subr.bf16.mxu0 %v749_v0 }
  0x89   :  { %612 = vmatpush3.bf16.msra.mxu0 %v611_v16 }
 0x13f   :  { %v170_v10 = vpop.f32.mrb[0].mxu0 }
 0x140   :  { %v171_v11 = vadd.f32 %v382_v9, %v170_v10  ;;  %v470_v12 = vpop.f32.mrb[1].mxu0 }
 0x142   :  { %v174_v13 = vmax.f32 %v171_v11, 0.0 }
 0x144   :  { %504 = vmatmul.mubr.f32.vlgmr.msra.gmra.mrb[0].mxu1 %v174_v13 }
 0x217   :  { %v264_v18 = vpop.f32.mrb[0].mxu1 }
 0x218   :  { %v265_v19 = vadd.f32 %v383_v17, %v264_v18  ;;  %v505_v0 = vpop.f32.mrb[1].mxu1 }
 0x21a   :  { %v268_v20 = vmax.f32 %v265_v19, 0.0 }
 0x21c   :  { %539 = vmatmul.mubr.f32.vlgmr.msra.gmra.mrb[2].mxu0 %v268_v20 }
 0x2ef   :  { %v358_v22 = vpop.f32.mrb[2].mxu0 }
 0x2f0   :  { %v359_v23 = vadd.f32 %v384_v21, %v358_v22  ;;  %v540_v24 = vpop.f32.mrb[3].mxu0 }
 0x2f2   :  { %623 = vtanh.f32 %v359_v23 }
 0x2fc   :  { %v624_v25 = vpop.eup %623 }
 0x2fd   :  { %v363_v26 = vmul.f32 2.0, %v624_v25 }
 0x2ff   :  { %364 = vst [vmem:[#allocation10] sm:$0xff] %v363_v26 }
 0x300   :  { %724 = shalt.err (!%p721_p8)
}
 0x301   :  { %s725_s6 = scalar_lea.hbm %s908_s7, 128 }
 0x302   :  { %p726_p9 = scmp.ne.s32.totalorder %s908_s7, %s725_s6  ;;  %p729_p10 = scmp.lt.u32.totalorder %s725_s6, %s908_s7 }
 0x304   :  { %p731_p11 = pnand %p729_p10, %p726_p9 }
 0x306   :  { %734 = shalt.err (!%p731_p11)
}
 0x307   :  { %374 = dma.vmem_to_hbm [thread:$0]  %s372_s29, 128, %s908_s7, [#allocation4]  }
 0x308   :  { %741 = dma.done.wait [#allocation4], 128  }
 0x309   :  { %742 = vsyncadd [#allocation4], 4294967168 }
 0x30a   :  { %378 = vsyncpa [#allocation3], 1 }
 0x30b   :  { %379 = vsyncpa [#allocation6], 1 }
 0x30c   :  { %380 = vsyncpa [#allocation9], 1 }
 0x30d   :  { %381 = vsyncpa [#allocation4], 1 }

// kernel: tpu_custom_call.1
= control target key start
LH: loop header
LB: loop body
LE: loop exit
PB: predicated region body
PF: predicated region fallthrough
CT: control target
= control target key end

     0   :  { %12 = vsyncpa [#allocation3], 0  ;;  %s901_s0 = inlined_call_operand.hbm [shape: f32[8,128], index: 0, kind: input, shape index: {}]   ;;  %s902_s1 = inlined_call_operand.hbm [shape: f32[128,128], index: 1, kind: input, shape index: {}]   ;;  %s903_s2 = inlined_call_operand.vmem [shape: f32[1,128], index: 2, kind: input, shape index: {}]   ;;  %s904_s3 = inlined_call_operand.hbm [shape: f32[128,128], index: 3, kind: input, shape index: {}]   ;;  %s905_s4 = inlined_call_operand.vmem [shape: f32[1,128], index: 4, kind: input, shape index: {}]   ;;  %s906_s5 = inlined_call_operand.hbm [shape: f32[128,128], index: 5, kind: input, shape index: {}]   ;;  %s907_s6 = inlined_call_operand.vmem [shape: f32[1,128], index: 6, kind: input, shape index: {}]   ;;  %s908_s7 = inlined_call_operand.hbm [shape: f32[8,128], index: 7, kind: output, shape index: {}]  }
   0x1   :  { %13 = vsyncpa [#allocation6], 0 }
   0x2   :  { %14 = vsyncpa [#allocation9], 0 }
   0x3   :  { %15 = vsyncpa [#allocation4], 0  ;;  %s743_s24 = smov [#allocation5]   ;;  %s625_s28 = scalar_lea.hbm %s902_s1, 2048 }
   0x4   :  { %s31_s25 = sshll.u32 %s743_s24, 4  ;;  %p626_p0 = scmp.ne.s32.totalorder %s902_s1, %s625_s28  ;;  %s32_s25 = int_to_ptr.vmem [resolvable:$true] %s31_s25 }
   0x5   :  { %p629_p1 = scmp.lt.u32.totalorder %s625_s28, %s902_s1 }
   0x7   :  { %p631_p2 = pnand %p629_p1, %p626_p0 }
   0x9   :  { %634 = shalt.err (!%p631_p2)
}
   0xa   :  { %s635_s10 = scalar_lea.vmem %s32_s25, 2048  ;;  %p640_p4 = scmp.lt.s32.totalorder %s32_s25, %s32_s25 }
   0xb   :  { %p636_p3 = scmp.ne.s32.totalorder %s32_s25, %s635_s10  ;;  %p641_p5 = scmp.lt.s32.totalorder %s635_s10, %s635_s10 }
   0xd   :  { %p642_p6 = por %p641_p5, %p640_p4 }
   0xf   :  { %p643_p7 = pnand %p642_p6, %p636_p3 }
  0x11   :  { %646 = shalt.err (!%p643_p7)
}
  0x12   :  { %s744_s11 = smov 128   ;;  %s745_s12 = smov 8  }
  0x13   :  { %37 = dma.hbm_to_vmem [thread:$0]  %s902_s1, 2048, %s32_s25, [#allocation6], %s744_s11, %s744_s11, %s745_s12  }
  0x14   :  { %s746_s15 = smov [#allocation2]   ;;  %s747_s17 = smov [#allocation7]  }
  0x15   :  { %s22_s16 = sshll.u32 %s746_s15, 4  ;;  %s45_s18 = sshll.u32 %s747_s17, 4  ;;  %s23_s16 = int_to_ptr.vmem [resolvable:$true] %s22_s16  ;;  %s46_s18 = int_to_ptr.vmem [resolvable:$true] %s45_s18 }
  0x16   :  { %s647_s21 = scalar_lea.hbm %s901_s0, 128 }
  0x17   :  { %p648_p8 = scmp.ne.s32.totalorder %s901_s0, %s647_s21  ;;  %p651_p9 = scmp.lt.u32.totalorder %s647_s21, %s901_s0 }
  0x19   :  { %p653_p10 = pnand %p651_p9, %p648_p8 }
  0x1b   :  { %656 = shalt.err (!%p653_p10)
}
  0x1c   :  { %s657_s1 = scalar_lea.vmem %s23_s16, 128  ;;  %p662_p12 = scmp.lt.s32.totalorder %s23_s16, %s23_s16 }
  0x1d   :  { %p658_p11 = scmp.ne.s32.totalorder %s23_s16, %s657_s1  ;;  %p663_p13 = scmp.lt.s32.totalorder %s657_s1, %s657_s1 }
  0x1f   :  { %p664_p0 = por %p663_p13, %p662_p12 }
  0x21   :  { %p665_p1 = pnand %p664_p0, %p658_p11 }
  0x23   :  { %668 = shalt.err (!%p665_p1)
}
  0x24   :  { %25 = dma.hbm_to_vmem [thread:$0]  %s901_s0, 128, %s23_s16, [#allocation3]  }
  0x25   :  { %s669_s30 = scalar_lea.hbm %s904_s3, 2048 }
  0x26   :  { %p670_p2 = scmp.ne.s32.totalorder %s904_s3, %s669_s30  ;;  %p673_p3 = scmp.lt.u32.totalorder %s669_s30, %s904_s3 }
  0x28   :  { %p675_p4 = pnand %p673_p3, %p670_p2 }
  0x2a   :  { %678 = shalt.err (!%p675_p4)
}
  0x2b   :  { %s679_s14 = scalar_lea.vmem %s46_s18, 2048  ;;  %p684_p6 = scmp.lt.s32.totalorder %s46_s18, %s46_s18 }
  0x2c   :  { %p680_p5 = scmp.ne.s32.totalorder %s46_s18, %s679_s14  ;;  %p685_p7 = scmp.lt.s32.totalorder %s679_s14, %s679_s14 }
  0x2e   :  { %p686_p8 = por %p685_p7, %p684_p6 }
  0x30   :  { %p687_p9 = pnand %p686_p8, %p680_p5 }
  0x32   :  { %690 = shalt.err (!%p687_p9)
}
  0x33   :  { %51 = dma.hbm_to_vmem [thread:$0]  %s904_s3, 2048, %s46_s18, [#allocation6], %s744_s11, %s744_s11, %s745_s12  }
  0x34   :  { %s748_s16 = smov [#allocation8]   ;;  %s691_s21 = scalar_lea.hbm %s906_s5, 2048 }
  0x35   :  { %s59_s17 = sshll.u32 %s748_s16, 4  ;;  %p692_p10 = scmp.ne.s32.totalorder %s906_s5, %s691_s21  ;;  %s60_s17 = int_to_ptr.vmem [resolvable:$true] %s59_s17 }
  0x36   :  { %p695_p11 = scmp.lt.u32.totalorder %s691_s21, %s906_s5 }
  0x38   :  { %p697_p12 = pnand %p695_p11, %p692_p10 }
  0x3a   :  { %700 = shalt.err (!%p697_p12)
}
  0x3b   :  { %s701_s1 = scalar_lea.vmem %s60_s17, 2048  ;;  %p706_p0 = scmp.lt.s32.totalorder %s60_s17, %s60_s17 }
  0x3c   :  { %p702_p13 = scmp.ne.s32.totalorder %s60_s17, %s701_s1  ;;  %p707_p1 = scmp.lt.s32.totalorder %s701_s1, %s701_s1 }
  0x3e   :  { %p708_p2 = por %p707_p1, %p706_p0 }
  0x40   :  { %p709_p3 = pnand %p708_p2, %p702_p13 }
  0x42   :  { %712 = shalt.err (!%p709_p3)
}
  0x43   :  { %65 = dma.hbm_to_vmem [thread:$0]  %s906_s5, 2048, %s60_s17, [#allocation9], %s744_s11, %s744_s11, %s745_s12  }
  0x44   :  { %735 = dma.done.wait [#allocation3], 128  }
  0x45   :  { %736 = vsyncadd [#allocation3], 4294967168 }
  0x46   :  { %737 = dma.done.wait [#allocation6], 4096  }
  0x47   :  { %738 = vsyncadd [#allocation6], 4294963200 }
  0x48   :  { %739 = dma.done.wait [#allocation9], 2048  }
  0x49   :  { %740 = vsyncadd [#allocation9], 4294965248  ;;  %v749_v0 = vmov 0.0|0.0   ;;  %vm750_vm0 = vmmov 0   ;;  %v751_v1 = vmov 0.0   ;;  %v81_v2 = vld [vmem:[#allocation5] sm:$0xff] }
  0x4a   :  { %541 = vmatprep.subr.bf16.mxu0 %v749_v0  ;;  %468 = vmatprep.mubr.msk.f32.mxu0 %vm750_vm0, %v751_v1  ;;  %v82_v3 = vld [vmem:[#allocation5 + $0x8] sm:$0xff]  ;;  %v83_v4 = vld [vmem:[#allocation5 + $0x10] sm:$0xff]  ;;  %v84_v6 = vld [vmem:[#allocation5 + $0x18] sm:$0xff]  ;;  %s752_s28 = smov [#allocation10]  }
  0x4b   :  { %565 = vmatprep.subr.bf16.mxu1 %v749_v0  ;;  %503 = vmatprep.mubr.msk.f32.mxu1 %vm750_vm0, %v751_v1  ;;  %v542_v5 = vpack.c.bf16 %v82_v3, %v81_v2  ;;  %v545_v7 = vpack.c.bf16 %v84_v6, %v83_v4  ;;  %v85_v8 = vld [vmem:[#allocation5 + $0x20] sm:$0xff]  ;;  %v86_v9 = vld [vmem:[#allocation5 + $0x28] sm:$0xff]  ;;  %v177_v12 = vld [vmem:[#allocation7 + $0x10] sm:$0xff]  ;;  %s371_s29 = sshll.u32 %s752_s28, 4  ;;  %s372_s29 = int_to_ptr.vmem [resolvable:$true] %s371_s29 }
  0x4c   :  { %v175_v10 = vld [vmem:[#allocation7] sm:$0xff]  ;;  %v176_v11 = vld [vmem:[#allocation7 + $0x8] sm:$0xff]  ;;  %v178_v13 = vld [vmem:[#allocation7 + $0x18] sm:$0xff]  ;;  %v548_v14 = vpack.c.bf16 %v86_v9, %v85_v8  ;;  %p718_p5 = scmp.lt.s32.totalorder %s372_s29, %s372_s29 }
  0x4d   :  { %543 = vmatpush3.bf16.msra.mxu0 %v542_v5  ;;  %v566_v15 = vpack.c.bf16 %v176_v11, %v175_v10  ;;  %v87_v16 = vld [vmem:[#allocation5 + $0x30] sm:$0xff]  ;;  %v88_v17 = vld [vmem:[#allocation5 + $0x38] sm:$0xff]  ;;  %v569_v18 = vpack.c.bf16 %v178_v13, %v177_v12  ;;  %v179_v19 = vld [vmem:[#allocation7 + $0x20] sm:$0xff] }
  0x4e   :  { %544 = vmatprep.subr.bf16.mxu0 %v749_v0  ;;  %v180_v20 = vld [vmem:[#allocation7 + $0x28] sm:$0xff]  ;;  %v551_v21 = vpack.c.bf16 %v88_v17, %v87_v16  ;;  %v89_v22 = vld [vmem:[#allocation5 + $0x40] sm:$0xff]  ;;  %v181_v25 = vld [vmem:[#allocation7 + $0x30] sm:$0xff] }
  0x4f   :  { %567 = vmatpush3.bf16.msra.mxu1 %v566_v15  ;;  %v90_v23 = vld [vmem:[#allocation5 + $0x48] sm:$0xff]  ;;  %v572_v24 = vpack.c.bf16 %v180_v20, %v179_v19  ;;  %v182_v26 = vld [vmem:[#allocation7 + $0x38] sm:$0xff]  ;;  %v91_v28 = vld [vmem:[#allocation5 + $0x50] sm:$0xff] }
  0x50   :  { %568 = vmatprep.subr.bf16.mxu1 %v749_v0  ;;  %v554_v27 = vpack.c.bf16 %v90_v23, %v89_v22  ;;  %v92_v29 = vld [vmem:[#allocation5 + $0x58] sm:$0xff]  ;;  %v575_v30 = vpack.c.bf16 %v182_v26, %v181_v25  ;;  %v183_v31 = vld [vmem:[#allocation7 + $0x40] sm:$0xff]  ;;  %v184_v32 = vld [vmem:[#allocation7 + $0x48] sm:$0xff] }
  0x51   :  { %546 = vmatpush3.bf16.msra.mxu0 %v545_v7  ;;  %v557_v33 = vpack.c.bf16 %v92_v29, %v91_v28  ;;  %v93_v34 = vld [vmem:[#allocation5 + $0x60] sm:$0xff]  ;;  %v94_v35 = vld [vmem:[#allocation5 + $0x68] sm:$0xff]  ;;  %v578_v36 = vpack.c.bf16 %v184_v32, %v183_v31  ;;  %v185_v37 = vld [vmem:[#allocation7 + $0x50] sm:$0xff] }
  0x52   :  { %547 = vmatprep.subr.bf16.mxu0 %v749_v0  ;;  %v186_v38 = vld [vmem:[#allocation7 + $0x58] sm:$0xff]  ;;  %v560_v39 = vpack.c.bf16 %v94_v35, %v93_v34  ;;  %v95_v40 = vld [vmem:[#allocation5 + $0x70] sm:$0xff]  ;;  %v187_v43 = vld [vmem:[#allocation7 + $0x60] sm:$0xff] }
  0x53   :  { %570 = vmatpush3.bf16.msra.mxu1 %v569_v18  ;;  %v96_v41 = vld [vmem:[#allocation5 + $0x78] sm:$0xff]  ;;  %v581_v42 = vpack.c.bf16 %v186_v38, %v185_v37  ;;  %v188_v44 = vld [vmem:[#allocation7 + $0x68] sm:$0xff]  ;;  %v189_v48 = vld [vmem:[#allocation7 + $0x70] sm:$0xff] }
  0x54   :  { %571 = vmatprep.subr.bf16.mxu1 %v749_v0  ;;  %v563_v45 = vpack.c.bf16 %v96_v41, %v95_v40  ;;  %v584_v46 = vpack.c.bf16 %v188_v44, %v187_v43  ;;  %v80_v47 = vld [vmem:[#allocation2] sm:$0xff]  ;;  %v269_v51 = vld [vmem:[#allocation8] sm:$0xff]  ;;  %v270_v52 = vld [vmem:[#allocation8 + $0x8] sm:$0xff] }
  0x55   :  { %549 = vmatpush3.bf16.msra.mxu0 %v548_v14  ;;  %v190_v49 = vld [vmem:[#allocation7 + $0x78] sm:$0xff]  ;;  %v271_v53 = vld [vmem:[#allocation8 + $0x10] sm:$0xff]  ;;  %v590_v54 = vpack.c.bf16 %v270_v52, %v269_v51  ;;  %v273_v57 = vld [vmem:[#allocation8 + $0x20] sm:$0xff] }
  0x56   :  { %550 = vmatprep.subr.bf16.mxu0 %v749_v0  ;;  %v587_v50 = vpack.c.bf16 %v190_v49, %v189_v48  ;;  %v272_v55 = vld [vmem:[#allocation8 + $0x18] sm:$0xff]  ;;  %v274_v58 = vld [vmem:[#allocation8 + $0x28] sm:$0xff]  ;;  %v275_v60 = vld [vmem:[#allocation8 + $0x30] sm:$0xff] }
  0x57   :  { %573 = vmatpush3.bf16.msra.mxu1 %v572_v24  ;;  %v593_v56 = vpack.c.bf16 %v272_v55, %v271_v53  ;;  %v596_v59 = vpack.c.bf16 %v274_v58, %v273_v57  ;;  %v276_v61 = vld [vmem:[#allocation8 + $0x38] sm:$0xff]  ;;  %v277_v63 = vld [vmem:[#allocation8 + $0x40] sm:$0xff]  ;;  %v279_v3 = vld [vmem:[#allocation8 + $0x50] sm:$0xff] }
  0x58   :  { %574 = vmatprep.subr.bf16.mxu1 %v749_v0  ;;  %v599_v62 = vpack.c.bf16 %v276_v61, %v275_v60  ;;  %v280_v4 = vld [vmem:[#allocation8 + $0x58] sm:$0xff]  ;;  %v281_v6 = vld [vmem:[#allocation8 + $0x60] sm:$0xff]  ;;  %v282_v7 = vld [vmem:[#allocation8 + $0x68] sm:$0xff] }
  0x59   :  { %552 = vmatpush3.bf16.msra.mxu0 %v551_v21  ;;  %v605_v5 = vpack.c.bf16 %v280_v4, %v279_v3  ;;  %v608_v8 = vpack.c.bf16 %v282_v7, %v281_v6  ;;  %v382_v9 = vld [vmem:[%s903_s2] ss:$0 sm:$0xff]  ;;  %v283_v14 = vld [vmem:[#allocation8 + $0x70] sm:$0xff] }
  0x5a   :  { %553 = vmatprep.subr.bf16.mxu0 %v749_v0  ;;  %v284_v15 = vld [vmem:[#allocation8 + $0x78] sm:$0xff] }
  0x5b   :  { %576 = vmatpush3.bf16.msra.mxu1 %v575_v30  ;;  %v611_v16 = vpack.c.bf16 %v284_v15, %v283_v14  ;;  %v383_v17 = vld [vmem:[%s905_s4] ss:$0 sm:$0xff]  ;;  %s713_s4 = scalar_lea.vmem %s372_s29, 128 }
  0x5c   :  { %577 = vmatprep.subr.bf16.mxu1 %v749_v0  ;;  %v384_v21 = vld [vmem:[%s907_s6] ss:$0 sm:$0xff]  ;;  %p714_p4 = scmp.ne.s32.totalorder %s372_s29, %s713_s4  ;;  %p719_p6 = scmp.lt.s32.totalorder %s713_s4, %s713_s4 }
  0x5d   :  { %555 = vmatpush3.bf16.msra.mxu0 %v554_v27 }
  0x5e   :  { %556 = vmatprep.subr.bf16.mxu0 %v749_v0  ;;  %p720_p7 = por %p719_p6, %p718_p5 }
  0x5f   :  { %579 = vmatpush3.bf16.msra.mxu1 %v578_v36 }
  0x60   :  { %580 = vmatprep.subr.bf16.mxu1 %v749_v0  ;;  %p721_p8 = pnand %p720_p7, %p714_p4 }
  0x61   :  { %558 = vmatpush3.bf16.msra.mxu0 %v557_v33 }
  0x62   :  { %559 = vmatprep.subr.bf16.mxu0 %v749_v0 }
  0x63   :  { %582 = vmatpush3.bf16.msra.mxu1 %v581_v42 }
  0x64   :  { %583 = vmatprep.subr.bf16.mxu1 %v749_v0 }
  0x65   :  { %561 = vmatpush3.bf16.msra.mxu0 %v560_v39 }
  0x66   :  { %562 = vmatprep.subr.bf16.mxu0 %v749_v0 }
  0x67   :  { %585 = vmatpush3.bf16.msra.mxu1 %v584_v46 }
  0x68   :  { %586 = vmatprep.subr.bf16.mxu1 %v749_v0 }
  0x69   :  { %564 = vmatpush3.bf16.msra.mxu0 %v563_v45 }
  0x6a   :  { %589 = vmatprep.subr.bf16.mxu0 %v749_v0 }
  0x6b   :  { %588 = vmatpush3.bf16.msra.mxu1 %v587_v50 }
  0x6c   :  { %469 = vmatmul.mubr.f32.vlgmr.msra.gmra.mrb[0].mxu0 %v80_v47 }
  0x6d   :  { %538 = vmatprep.mubr.msk.f32.mxu0 %vm750_vm0, %v751_v1  ;;  %591 = vmatpush3.bf16.msra.mxu0 %v590_v54  ;;  %v278_v1 = vld [vmem:[#allocation8 + $0x48] sm:$0xff] }
  0x6e   :  { %592 = vmatprep.subr.bf16.mxu0 %v749_v0  ;;  %v602_v2 = vpack.c.bf16 %v278_v1, %v277_v63 }
  0x71   :  { %594 = vmatpush3.bf16.msra.mxu0 %v593_v56 }
  0x72   :  { %595 = vmatprep.subr.bf16.mxu0 %v749_v0 }
  0x75   :  { %597 = vmatpush3.bf16.msra.mxu0 %v596_v59 }
  0x76   :  { %598 = vmatprep.subr.bf16.mxu0 %v749_v0 }
  0x79   :  { %600 = vmatpush3.bf16.msra.mxu0 %v599_v62 }
  0x7a   :  { %601 = vmatprep.subr.bf16.mxu0 %v749_v0 }
  0x7d   :  { %603 = vmatpush3.bf16.msra.mxu0 %v602_v2 }
  0x7e   :  { %604 = vmatprep.subr.bf16.mxu0 %v749_v0 }
  0x81   :  { %606 = vmatpush3.bf16.msra.mxu0 %v605_v5 }
  0x82   :  { %607 = vmatprep.subr.bf16.mxu0 %v749_v0 }
  0x85   :  { %609 = vmatpush3.bf16.msra.mxu0 %v608_v8 }
  0x86   :  { %610 = vmatprep.subr.bf16.mxu0 %v749_v0 }
  0x89   :  { %612 = vmatpush3.bf16.msra.mxu0 %v611_v16 }
 0x13f   :  { %v170_v10 = vpop.f32.mrb[0].mxu0 }
 0x140   :  { %v171_v11 = vadd.f32 %v382_v9, %v170_v10  ;;  %v470_v12 = vpop.f32.mrb[1].mxu0 }
 0x142   :  { %v174_v13 = vmax.f32 %v171_v11, 0.0 }
 0x144   :  { %504 = vmatmul.mubr.f32.vlgmr.msra.gmra.mrb[0].mxu1 %v174_v13 }
 0x217   :  { %v264_v18 = vpop.f32.mrb[0].mxu1 }
 0x218   :  { %v265_v19 = vadd.f32 %v383_v17, %v264_v18  ;;  %v505_v0 = vpop.f32.mrb[1].mxu1 }
 0x21a   :  { %v268_v20 = vmax.f32 %v265_v19, 0.0 }
 0x21c   :  { %539 = vmatmul.mubr.f32.vlgmr.msra.gmra.mrb[2].mxu0 %v268_v20 }
 0x2ef   :  { %v358_v22 = vpop.f32.mrb[2].mxu0 }
 0x2f0   :  { %v359_v23 = vadd.f32 %v384_v21, %v358_v22  ;;  %v540_v24 = vpop.f32.mrb[3].mxu0 }
 0x2f2   :  { %623 = vtanh.f32 %v359_v23 }
 0x2fc   :  { %v624_v25 = vpop.eup %623 }
 0x2fd   :  { %v363_v26 = vmul.f32 2.0, %v624_v25 }
 0x2ff   :  { %364 = vst [vmem:[#allocation10] sm:$0xff] %v363_v26 }
 0x300   :  { %724 = shalt.err (!%p721_p8)
}
 0x301   :  { %s725_s6 = scalar_lea.hbm %s908_s7, 128 }
 0x302   :  { %p726_p9 = scmp.ne.s32.totalorder %s908_s7, %s725_s6  ;;  %p729_p10 = scmp.lt.u32.totalorder %s725_s6, %s908_s7 }
 0x304   :  { %p731_p11 = pnand %p729_p10, %p726_p9 }
 0x306   :  { %734 = shalt.err (!%p731_p11)
}
 0x307   :  { %374 = dma.vmem_to_hbm [thread:$0]  %s372_s29, 128, %s908_s7, [#allocation4]  }
 0x308   :  { %741 = dma.done.wait [#allocation4], 128  }
 0x309   :  { %742 = vsyncadd [#allocation4], 4294967168 }
 0x30a   :  { %378 = vsyncpa [#allocation3], 1 }
 0x30b   :  { %379 = vsyncpa [#allocation6], 1 }
 0x30c   :  { %380 = vsyncpa [#allocation9], 1 }
 0x30d   :  { %381 = vsyncpa [#allocation4], 1 }

</bundles_post_ra>
